<compile_context>
chip_gen: v5e
topology: v5e:2x2
jax: 0.10.0
libtpu: 0.0.40
codegen_flags: <defaults>
</compile_context>

<pallas_src>
import functools

import jax
import jax.numpy as jnp
from jax.experimental import pallas as pl
from jax.experimental.pallas import tpu as pltpu


_DEFAULT_MAX_ROW_TILE = 4096   # (2, 4096, 128) f32 logits block = 4 MiB
# TODO(synk): per-generation tuning (v6e could take 8192; v7x should stay at
#             <=4096 due to its 64 MiB physical VMEM) would need a
#             pltpu.get_tpu_info() gate; this single value is safe everywhere.


def _mixed_loss_kernel(x_ref, t_ref, part_ref, *, gamma, hw, tiles_per_chunk,
                       need_mask):
    """One (TR, 128)-pixel tile of one image.

    x_ref    : (2, TR, 128)  logits (class0, class1), f32 or bf16
    t_ref    : (TR, 128)     integer labels in {0, 1}
    part_ref : (4, 8, 128)   per-(image, chunk) accumulator:
               rows = [focal, p1, 1{t==1}, p1 * 1{t==1}]
    """
    ti = pl.program_id(2)

    @pl.when(ti == 0)
    def _():
        part_ref[...] = jnp.zeros_like(part_ref)

    x0 = x_ref[0].astype(jnp.float32)
    x1 = x_ref[1].astype(jnp.float32)
    is1 = t_ref[...] != 0

    # 2-class softmax == sigmoid on d = x1 - x0 (stable log-sigmoid form):
    #   log p1 = -softplus(-d) = min(d, 0) - log(1 + exp(-|d|))
    #   log p0 = log p1 - d
    d = x1 - x0
    e = jnp.exp(-jnp.abs(d))              # EUP exp
    lse = jnp.log(1.0 + e)                # EUP log
    logp1 = jnp.minimum(d, 0.0) - lse
    logp0 = logp1 - d

    logpt = jnp.where(is1, logp1, logp0)
    pt = jnp.exp(logpt)                   # EUP exp (matches torch pt = exp(logpt))
    p1 = jnp.where(is1, pt, 1.0 - pt)     # sigmoid(d) = prob of class 1

    one_minus = 1.0 - pt
    if gamma == 2.0:
        w = one_minus * one_minus
    elif gamma == 1.0:
        w = one_minus
    elif gamma == 0.0:
        w = jnp.ones_like(one_minus)
    else:
        w = one_minus ** gamma
    focal = w * (-logpt)

    t1 = is1.astype(jnp.float32)

    if need_mask:
        # Ragged tail (grid / lane padding): zero out invalid pixels.
        # jnp.where is a select, so NaN/Inf garbage in padded rows is inert.
        tr = focal.shape[0]
        chunk = pl.program_id(1)
        tile = chunk * tiles_per_chunk + ti         # global row-tile index
        base = tile * (tr * 128)
        row = jax.lax.broadcasted_iota(jnp.int32, (tr, 128), 0)
        lane = jax.lax.broadcasted_iota(jnp.int32, (tr, 128), 1)
        valid = (base + row * 128 + lane) < hw
        focal = jnp.where(valid, focal, 0.0)
        p1 = jnp.where(valid, p1, 0.0)
        t1 = jnp.where(valid, t1, 0.0)

    inter = p1 * t1

    def fold(v):
        # (TR, 128) -> (8, 128) with plain VPU adds when TR % 8 == 0,
        # else a (1, 128) cross-sublane reduce (only hit for tiny images).
        tr = v.shape[0]
        if tr % 8 == 0:
            return jnp.sum(v.reshape(tr // 8, 8, 128), axis=0)
        return jnp.sum(v, axis=0, keepdims=True)

    f_focal, f_p1, f_t1, f_inter = fold(focal), fold(p1), fold(t1), fold(inter)
    k = f_focal.shape[0]
    part_ref[0, 0:k, :] += f_focal
    part_ref[1, 0:k, :] += f_p1
    part_ref[2, 0:k, :] += f_t1
    part_ref[3, 0:k, :] += f_inter


def mixed_loss(logits, target, *, alpha, gamma,
               max_row_tile=_DEFAULT_MAX_ROW_TILE):
    """logits: (B, 2, H, W) float (f32/bf16), target: (B, 1, H, W) int in {0,1}."""
    B, C, H, W = logits.shape
    assert C == 2, "MixedLoss/dice_loss assumes 2 classes"
    HW = H * W

    # Native-dtype pass-through (bf16 logits / narrow int labels kept as-is).
    if logits.dtype != jnp.float32 and logits.dtype != jnp.bfloat16:
        logits = logits.astype(jnp.float32)
    x = logits.reshape(B, 2, HW)

    t = target.reshape(B, HW)
    if t.dtype == jnp.bool_:
        t = t.astype(jnp.int8)
    elif t.dtype not in (jnp.int8, jnp.uint8, jnp.int32, jnp.uint32):
        t = t.astype(jnp.int32)

    # Pad the flat pixel axis only up to the 128-lane width; padded pixels are
    # removed again by the in-kernel validity mask.
    HW128 = ((HW + 127) // 128) * 128
    if HW128 != HW:
        # TODO(synk): a manual-DMA tail path could avoid this pad copy entirely.
        x = jnp.pad(x, ((0, 0), (0, 0), (0, HW128 - HW)))
        t = jnp.pad(t, ((0, 0), (0, HW128 - HW)))
    R = HW128 // 128
    x = x.reshape(B, 2, R, 128)   # free reshape
    t = t.reshape(B, R, 128)

    # Row tile: the full image if it fits, else a large fixed tile (multiple
    # of 32 so f32/bf16/int8 sublane tiling are all legal) + ragged-tail mask.
    max_row_tile = max(32, (int(max_row_tile) // 32) * 32)
    TR = R if R <= max_row_tile else max_row_tile
    NT = pl.cdiv(R, TR)                        # row tiles per image
    # Give both v7x TensorCores work even at batch 1 via a parallel chunk axis.
    NCHUNK = 2 if (B == 1 and NT >= 2) else 1
    T = pl.cdiv(NT, NCHUNK)                    # row tiles per chunk
    need_mask = (NCHUNK * T * TR * 128) != HW
    last_tile = NT - 1

    def x_map(b, c, r):
        return (b, 0, jnp.minimum(c * T + r, last_tile), 0)

    def t_map(b, c, r):
        return (b, jnp.minimum(c * T + r, last_tile), 0)

    kernel = functools.partial(
        _mixed_loss_kernel, gamma=float(gamma), hw=HW,
        tiles_per_chunk=T, need_mask=need_mask)

    partials = pl.pallas_call(
        kernel,
        out_shape=jax.ShapeDtypeStruct((B, NCHUNK, 4, 8, 128), jnp.float32),
        grid_spec=pltpu.PrefetchScalarGridSpec(
            num_scalar_prefetch=0,
            grid=(B, NCHUNK, T),
            in_specs=[
                pl.BlockSpec((None, 2, TR, 128), x_map),   # fused logits block
                pl.BlockSpec((None, TR, 128), t_map),      # labels
            ],
            out_specs=pl.BlockSpec((None, None, 4, 8, 128),
                                   lambda b, c, r: (b, c, 0, 0, 0)),
        ),
        compiler_params=pltpu.CompilerParams(
            dimension_semantics=("parallel", "parallel", "arbitrary"),
            vmem_limit_bytes=32 * 1024 * 1024),
    )(x, t)

    sums = jnp.sum(partials, axis=(0, 1, 3, 4))   # (4,) tiny JAX epilogue
    focal_sum, p1_sum, t_sum, inter_sum = sums[0], sums[1], sums[2], sums[3]

    focal_mean = focal_sum / jnp.float32(B * HW)

    smooth = jnp.float32(1.0)
    inter = inter_sum + smooth
    union = p1_sum + t_sum + smooth
    dice = -jnp.log(2.0 * inter / union)

    return alpha * focal_mean + dice


def _reference_mixed_loss(logits, target, *, alpha, gamma):
    """Pure-JAX reference mirroring the PyTorch module exactly."""
    B, C, H, W = logits.shape
    lf = logits.astype(jnp.float32)
    # focal
    x = lf.reshape(B, C, H * W).transpose(0, 2, 1).reshape(-1, C)
    tt = target.reshape(-1).astype(jnp.int32)
    logp = jax.nn.log_softmax(x, axis=1)
    logpt = jnp.take_along_axis(logp, tt[:, None], axis=1)[:, 0]
    pt = jnp.exp(logpt)
    focal = jnp.mean(-((1.0 - pt) ** gamma) * logpt)
    # dice
    p = jax.nn.softmax(lf, axis=1).reshape(B, C, -1)[:, 1, :]
    oh = (target.reshape(B, -1) == 1).astype(jnp.float32)
    inter = jnp.sum(p * oh) + 1.0
    union = jnp.sum(p) + jnp.sum(oh) + 1.0
    dice = -jnp.log(2.0 * inter / union)
    return alpha * focal + dice


if __name__ == "__main__":
    key = jax.random.PRNGKey(0)

    def check(name, B, H, W, *, dtype, tdtype, max_row_tile, tol, key):
        k1, k2 = jax.random.split(key)
        logits = jax.random.normal(k1, (B, 2, H, W), dtype=jnp.float32).astype(dtype)
        target = jax.random.randint(k2, (B, 1, H, W), 0, 2,
                                    dtype=jnp.int32).astype(tdtype)
        out = mixed_loss(logits, target, alpha=10.0, gamma=2.0,
                         max_row_tile=max_row_tile)
        out = jax.block_until_ready(out)
        ref = _reference_mixed_loss(logits, target, alpha=10.0, gamma=2.0)
        assert jnp.allclose(out, ref, rtol=tol, atol=tol), (name, out, ref)

    ks = jax.random.split(key, 3)
    # 1) primary case: f32 logits, int32 labels, aligned H*W, one tile/image.
    check("b2_f32", 2, 16, 16, dtype=jnp.float32, tdtype=jnp.int32,
          max_row_tile=_DEFAULT_MAX_ROW_TILE, tol=2e-5, key=ks[0])
    # 2) batch-1 with a small forced row tile: exercises the 2-chunk parallel
    #    axis, the cdiv grid and the ragged-tail mask.
    check("b1_masked", 1, 80, 80, dtype=jnp.float32, tdtype=jnp.int32,
          max_row_tile=32, tol=2e-5, key=ks[1])
    # 3) native bf16 logits + int8 labels (no wrapper cast passes).
    check("bf16_i8", 2, 64, 64, dtype=jnp.bfloat16, tdtype=jnp.int8,
          max_row_tile=_DEFAULT_MAX_ROW_TILE, tol=1e-3, key=ks[2])

    print("KERNEL_OK")
</pallas_src>

<mosaic_0001>
module attributes {stable_mosaic.version = 11 : i64} {
  func.func @_mixed_loss_kernel(%arg0: i32, %arg1: i32, %arg2: i32, %arg3: memref<1x2x2x128xf32, #tpu.memory_space<vmem>>, %arg4: memref<1x2x128xi32, #tpu.memory_space<vmem>>, %arg5: memref<1x1x4x8x128xf32, #tpu.memory_space<vmem>>) attributes {dimension_semantics = [#tpu.dimension_semantics<parallel>, #tpu.dimension_semantics<parallel>, #tpu.dimension_semantics<arbitrary>], iteration_bounds = array<i64: 2, 1, 1>, scalar_prefetch = 0 : i64, scratch_operands = 0 : i64, tpu.core_type = #tpu.core_type<tc>, window_params = [{transform_indices = @transform_0, window_bounds = array<i64: 1, 2, 2, 128>}, {transform_indices = @transform_1, window_bounds = array<i64: 1, 2, 128>}, {transform_indices = @transform_2, window_bounds = array<i64: 1, 1, 4, 8, 128>}]} {
    %c0_i32 = arith.constant 0 : i32
    %0 = arith.cmpi eq, %arg2, %c0_i32 : i32
    %1 = arith.extui %0 : i1 to i32
    %c0_i32_0 = arith.constant 0 : i32
    %2 = arith.cmpi ne, %1, %c0_i32_0 : i32
    scf.if %2 {
      %cst_58 = arith.constant 0.000000e+00 : f32
      %69 = vector.broadcast %cst_58 : f32 to vector<4x8x128xf32>
      %c0_59 = arith.constant 0 : index
      %c0_60 = arith.constant 0 : index
      %c0_61 = arith.constant 0 : index
      %c0_62 = arith.constant 0 : index
      %c0_63 = arith.constant 0 : index
      %70 = vector.load %arg5[%c0_59, %c0_60, %c0_61, %c0_62, %c0_63] : memref<1x1x4x8x128xf32, #tpu.memory_space<vmem>>, vector<1x1x4x8x128xf32>
      %71 = vector.shape_cast %70 : vector<1x1x4x8x128xf32> to vector<4x8x128xf32>
      %72 = vector.shape_cast %69 : vector<4x8x128xf32> to vector<1x1x4x8x128xf32>
      tpu.vector_store %arg5[%c0_59, %c0_60, %c0_61, %c0_62, %c0_63], %72 {strides = array<i32>} : memref<1x1x4x8x128xf32, #tpu.memory_space<vmem>>, vector<1x1x4x8x128xf32>,
    } else {
    }
    %c0 = arith.constant 0 : index
    %c0_1 = arith.constant 0 : index
    %c0_2 = arith.constant 0 : index
    %c0_3 = arith.constant 0 : index
    %3 = vector.load %arg3[%c0, %c0_1, %c0_2, %c0_3] : memref<1x2x2x128xf32, #tpu.memory_space<vmem>>, vector<1x1x2x128xf32>
    %4 = vector.shape_cast %3 : vector<1x1x2x128xf32> to vector<2x128xf32>
    %c0_4 = arith.constant 0 : index
    %c1 = arith.constant 1 : index
    %c0_5 = arith.constant 0 : index
    %c0_6 = arith.constant 0 : index
    %5 = vector.load %arg3[%c0_4, %c1, %c0_5, %c0_6] : memref<1x2x2x128xf32, #tpu.memory_space<vmem>>, vector<1x1x2x128xf32>
    %6 = vector.shape_cast %5 : vector<1x1x2x128xf32> to vector<2x128xf32>
    %c0_7 = arith.constant 0 : index
    %c0_8 = arith.constant 0 : index
    %c0_9 = arith.constant 0 : index
    %7 = vector.load %arg4[%c0_7, %c0_8, %c0_9] : memref<1x2x128xi32, #tpu.memory_space<vmem>>, vector<1x2x128xi32>
    %8 = vector.shape_cast %7 : vector<1x2x128xi32> to vector<2x128xi32>
    %c0_i32_10 = arith.constant 0 : i32
    %9 = vector.broadcast %c0_i32_10 : i32 to vector<2x128xi32>
    %10 = arith.cmpi ne, %8, %9 : vector<2x128xi32>
    %11 = arith.subf %6, %4 : vector<2x128xf32>
    %12 = math.absf %11 : vector<2x128xf32>
    %cst = arith.constant 0.000000e+00 : f32
    %13 = vector.broadcast %cst : f32 to vector<2x128xf32>
    %14 = arith.subf %13, %12 : vector<2x128xf32>
    %15 = math.exp %14 : vector<2x128xf32>
    %cst_11 = arith.constant 1.000000e+00 : f32
    %16 = vector.broadcast %cst_11 : f32 to vector<2x128xf32>
    %17 = arith.addf %16, %15 : vector<2x128xf32>
    %18 = math.log %17 : vector<2x128xf32>
    %cst_12 = arith.constant 0.000000e+00 : f32
    %19 = vector.broadcast %cst_12 : f32 to vector<2x128xf32>
    %20 = arith.minimumf %11, %19 : vector<2x128xf32>
    %21 = arith.subf %20, %18 : vector<2x128xf32>
    %22 = arith.subf %21, %11 : vector<2x128xf32>
    %23 = arith.select %10, %21, %22 : vector<2x128xi1>, vector<2x128xf32>
    %24 = math.exp %23 : vector<2x128xf32>
    %cst_13 = arith.constant 1.000000e+00 : f32
    %25 = vector.broadcast %cst_13 : f32 to vector<2x128xf32>
    %26 = arith.subf %25, %24 : vector<2x128xf32>
    %27 = arith.select %10, %24, %26 : vector<2x128xi1>, vector<2x128xf32>
    %cst_14 = arith.constant 1.000000e+00 : f32
    %28 = vector.broadcast %cst_14 : f32 to vector<2x128xf32>
    %29 = arith.subf %28, %24 : vector<2x128xf32>
    %30 = arith.mulf %29, %29 : vector<2x128xf32>
    %cst_15 = arith.constant 0.000000e+00 : f32
    %31 = vector.broadcast %cst_15 : f32 to vector<2x128xf32>
    %32 = arith.subf %31, %23 : vector<2x128xf32>
    %33 = arith.mulf %30, %32 : vector<2x128xf32>
    %34 = arith.extui %10 : vector<2x128xi1> to vector<2x128xi32>
    %35 = arith.sitofp %34 : vector<2x128xi32> to vector<2x128xf32>
    %36 = arith.mulf %27, %35 : vector<2x128xf32>
    %cst_16 = arith.constant dense<0.000000e+00> : vector<128xf32>
    %37 = vector.multi_reduction <add>, %33, %cst_16 [0] : vector<2x128xf32> to vector<128xf32>
    %38 = vector.shape_cast %37 : vector<128xf32> to vector<1x128xf32>
    %cst_17 = arith.constant dense<0.000000e+00> : vector<128xf32>
    %39 = vector.multi_reduction <add>, %27, %cst_17 [0] : vector<2x128xf32> to vector<128xf32>
    %40 = vector.shape_cast %39 : vector<128xf32> to vector<1x128xf32>
    %cst_18 = arith.constant dense<0.000000e+00> : vector<128xf32>
    %41 = vector.multi_reduction <add>, %35, %cst_18 [0] : vector<2x128xf32> to vector<128xf32>
    %42 = vector.shape_cast %41 : vector<128xf32> to vector<1x128xf32>
    %cst_19 = arith.constant dense<0.000000e+00> : vector<128xf32>
    %43 = vector.multi_reduction <add>, %36, %cst_19 [0] : vector<2x128xf32> to vector<128xf32>
    %44 = vector.shape_cast %43 : vector<128xf32> to vector<1x128xf32>
    %c0_20 = arith.constant 0 : index
    %c0_21 = arith.constant 0 : index
    %c0_22 = arith.constant 0 : index
    %c0_23 = arith.constant 0 : index
    %c0_24 = arith.constant 0 : index
    %45 = vector.load %arg5[%c0_20, %c0_21, %c0_22, %c0_23, %c0_24] : memref<1x1x4x8x128xf32, #tpu.memory_space<vmem>>, vector<1x1x1x1x128xf32>
    %46 = vector.shape_cast %45 : vector<1x1x1x1x128xf32> to vector<1x128xf32>
    %47 = arith.addf %46, %38 : vector<1x128xf32>
    %c0_25 = arith.constant 0 : index
    %c0_26 = arith.constant 0 : index
    %c0_27 = arith.constant 0 : index
    %c0_28 = arith.constant 0 : index
    %c0_29 = arith.constant 0 : index
    %48 = vector.load %arg5[%c0_25, %c0_26, %c0_27, %c0_28, %c0_29] : memref<1x1x4x8x128xf32, #tpu.memory_space<vmem>>, vector<1x1x1x1x128xf32>
    %49 = vector.shape_cast %48 : vector<1x1x1x1x128xf32> to vector<1x128xf32>
    %50 = vector.shape_cast %47 : vector<1x128xf32> to vector<1x1x1x1x128xf32>
    tpu.vector_store %arg5[%c0_25, %c0_26, %c0_27, %c0_28, %c0_29], %50 {strides = array<i32>} : memref<1x1x4x8x128xf32, #tpu.memory_space<vmem>>, vector<1x1x1x1x128xf32>,
    %c0_30 = arith.constant 0 : index
    %c0_31 = arith.constant 0 : index
    %c1_32 = arith.constant 1 : index
    %c0_33 = arith.constant 0 : index
    %c0_34 = arith.constant 0 : index
    %51 = vector.load %arg5[%c0_30, %c0_31, %c1_32, %c0_33, %c0_34] : memref<1x1x4x8x128xf32, #tpu.memory_space<vmem>>, vector<1x1x1x1x128xf32>
    %52 = vector.shape_cast %51 : vector<1x1x1x1x128xf32> to vector<1x128xf32>
    %53 = arith.addf %52, %40 : vector<1x128xf32>
    %c0_35 = arith.constant 0 : index
    %c0_36 = arith.constant 0 : index
    %c1_37 = arith.constant 1 : index
    %c0_38 = arith.constant 0 : index
    %c0_39 = arith.constant 0 : index
    %54 = vector.load %arg5[%c0_35, %c0_36, %c1_37, %c0_38, %c0_39] : memref<1x1x4x8x128xf32, #tpu.memory_space<vmem>>, vector<1x1x1x1x128xf32>
    %55 = vector.shape_cast %54 : vector<1x1x1x1x128xf32> to vector<1x128xf32>
    %56 = vector.shape_cast %53 : vector<1x128xf32> to vector<1x1x1x1x128xf32>
    tpu.vector_store %arg5[%c0_35, %c0_36, %c1_37, %c0_38, %c0_39], %56 {strides = array<i32>} : memref<1x1x4x8x128xf32, #tpu.memory_space<vmem>>, vector<1x1x1x1x128xf32>,
    %c0_40 = arith.constant 0 : index
    %c0_41 = arith.constant 0 : index
    %c2 = arith.constant 2 : index
    %c0_42 = arith.constant 0 : index
    %c0_43 = arith.constant 0 : index
    %57 = vector.load %arg5[%c0_40, %c0_41, %c2, %c0_42, %c0_43] : memref<1x1x4x8x128xf32, #tpu.memory_space<vmem>>, vector<1x1x1x1x128xf32>
    %58 = vector.shape_cast %57 : vector<1x1x1x1x128xf32> to vector<1x128xf32>
    %59 = arith.addf %58, %42 : vector<1x128xf32>
    %c0_44 = arith.constant 0 : index
    %c0_45 = arith.constant 0 : index
    %c2_46 = arith.constant 2 : index
    %c0_47 = arith.constant 0 : index
    %c0_48 = arith.constant 0 : index
    %60 = vector.load %arg5[%c0_44, %c0_45, %c2_46, %c0_47, %c0_48] : memref<1x1x4x8x128xf32, #tpu.memory_space<vmem>>, vector<1x1x1x1x128xf32>
    %61 = vector.shape_cast %60 : vector<1x1x1x1x128xf32> to vector<1x128xf32>
    %62 = vector.shape_cast %59 : vector<1x128xf32> to vector<1x1x1x1x128xf32>
    tpu.vector_store %arg5[%c0_44, %c0_45, %c2_46, %c0_47, %c0_48], %62 {strides = array<i32>} : memref<1x1x4x8x128xf32, #tpu.memory_space<vmem>>, vector<1x1x1x1x128xf32>,
    %c0_49 = arith.constant 0 : index
    %c0_50 = arith.constant 0 : index
    %c3 = arith.constant 3 : index
    %c0_51 = arith.constant 0 : index
    %c0_52 = arith.constant 0 : index
    %63 = vector.load %arg5[%c0_49, %c0_50, %c3, %c0_51, %c0_52] : memref<1x1x4x8x128xf32, #tpu.memory_space<vmem>>, vector<1x1x1x1x128xf32>
    %64 = vector.shape_cast %63 : vector<1x1x1x1x128xf32> to vector<1x128xf32>
    %65 = arith.addf %64, %44 : vector<1x128xf32>
    %c0_53 = arith.constant 0 : index
    %c0_54 = arith.constant 0 : index
    %c3_55 = arith.constant 3 : index
    %c0_56 = arith.constant 0 : index
    %c0_57 = arith.constant 0 : index
    %66 = vector.load %arg5[%c0_53, %c0_54, %c3_55, %c0_56, %c0_57] : memref<1x1x4x8x128xf32, #tpu.memory_space<vmem>>, vector<1x1x1x1x128xf32>
    %67 = vector.shape_cast %66 : vector<1x1x1x1x128xf32> to vector<1x128xf32>
    %68 = vector.shape_cast %65 : vector<1x128xf32> to vector<1x1x1x1x128xf32>
    tpu.vector_store %arg5[%c0_53, %c0_54, %c3_55, %c0_56, %c0_57], %68 {strides = array<i32>} : memref<1x1x4x8x128xf32, #tpu.memory_space<vmem>>, vector<1x1x1x1x128xf32>,
    return
  }
  func.func @transform_0(%arg0: i32, %arg1: i32, %arg2: i32) -> (i32, i32, i32, i32) {
    %c1_i32 = arith.constant 1 : i32
    %0 = arith.muli %arg1, %c1_i32 : i32
    %1 = arith.addi %0, %arg2 : i32
    %c0_i32 = arith.constant 0 : i32
    %2 = arith.minsi %1, %c0_i32 : i32
    %c0_i32_0 = arith.constant 0 : i32
    %c0_i32_1 = arith.constant 0 : i32
    %c0_i32_2 = arith.constant 0 : i32
    return %arg0, %c0_i32_0, %2, %c0_i32_1 : i32, i32, i32, i32
  }
  func.func @transform_1(%arg0: i32, %arg1: i32, %arg2: i32) -> (i32, i32, i32) {
    %c1_i32 = arith.constant 1 : i32
    %0 = arith.muli %arg1, %c1_i32 : i32
    %1 = arith.addi %0, %arg2 : i32
    %c0_i32 = arith.constant 0 : i32
    %2 = arith.minsi %1, %c0_i32 : i32
    %c0_i32_0 = arith.constant 0 : i32
    %c0_i32_1 = arith.constant 0 : i32
    return %arg0, %2, %c0_i32_0 : i32, i32, i32
  }
  func.func @transform_2(%arg0: i32, %arg1: i32, %arg2: i32) -> (i32, i32, i32, i32, i32) {
    %c0_i32 = arith.constant 0 : i32
    %c0_i32_0 = arith.constant 0 : i32
    %c0_i32_1 = arith.constant 0 : i32
    %c0_i32_2 = arith.constant 0 : i32
    return %arg0, %arg1, %c0_i32, %c0_i32_0, %c0_i32_1 : i32, i32, i32, i32, i32
  }
}

</mosaic_0001>

<bundles_post_ra>
// kernel: tpu_custom_call.1
= control target key start
LH: loop header
LB: loop body
LE: loop exit
PB: predicated region body
PF: predicated region fallthrough
CT: control target
= control target key end

     0   :  { %7 = vsyncpa [#allocation3], 0  ;;  %s899_s0 = inlined_call_operand.hbm [shape: f32[2,2,2,128], index: 0, kind: input, shape index: {}]   ;;  %s900_s1 = inlined_call_operand.hbm [shape: s32[2,2,128], index: 1, kind: input, shape index: {}]   ;;  %s901_s2 = inlined_call_operand.hbm [shape: f32[2,1,4,8,128], index: 2, kind: output, shape index: {}]  }
   0x1   :  { %9 = vsyncpa [#allocation3 + $0x1], 0 }
   0x2   :  { %10 = vsyncpa [#allocation6], 0 }
   0x3   :  { %12 = vsyncpa [#allocation6 + $0x1], 0 }
   0x4   :  { %13 = vsyncpa [#allocation4], 0 }
   0x5   :  { %15 = vsyncpa [#allocation4 + $0x1], 0  ;;  %s738_s9 = smov 0   ;;  %s740_s10 = smov 0  }
   0x6   :  { %s742_s11 = smov 0   ;;  %s744_s12 = smov 0  }
   0x7   :  { %s746_s13 = smov 0   ;;  %s748_s14 = smov 0  }
   0x8 LB: > { %s464_s15 = sadd.s32 4294967295, %s716_s14   ;;  %s465_s16 = sadd.s32 4294967294, %s716_s14   ;;  %s716_s14 = sphi %s748_s14, %s21_s14   ;;  %s712_s13 = sphi %s746_s13, %s911_s13   ;;  %s708_s12 = sphi %s744_s12, %s910_s12   ;;  %s704_s11 = sphi %s742_s11, %s909_s11   ;;  %s700_s10 = sphi %s740_s10, %s908_s10   ;;  %s696_s9 = sphi %s738_s9, %s907_s9  }
   0x9   : > { %s40_s17 = sadd.s32 1, %s712_s13  ;;  %s55_s18 = sadd.s32 1, %s704_s11 }
   0xa   : > { %p42_p0 = scmp.ge.s32.totalorder %s40_s17, 2  ;;  %p62_p1 = scmp.ne.s32.totalorder %s704_s11, %s700_s10 }
   0xb   : > { %p63_p2 = scmp.eq.s32.totalorder %s716_s14, 0  ;;  %p68_p3 = scmp.ne.s32.totalorder %s700_s10, %s696_s9 }
   0xc   : > { %s913_s17 = smov (%p42_p0, %s40_s17), 0  ;;  %p69_p5 = scmp.eq.s32.totalorder %s464_s15, 0 }
   0xd   : > { %p779_p4 = por %p63_p2, %p62_p1  ;;  %s50_s20 = ssub.s32 %s712_s13, %s913_s17 }
   0xe   : > { %p128_p6 = scmp.eq.s32.totalorder %s464_s15, 1  ;;  %p53_p7 = scmp.eq.s32.totalorder %s50_s20, 0 }
   0xf   : > { %p785_p8 = por %p69_p5, %p68_p3  ;;  %p134_p10 = scmp.eq.s32.totalorder %s465_s16, 1 }
  0x10   : > { %p789_p9 = por %p128_p6, %p62_p1  ;;  %p467_p12 = scmp.ge.s32.totalorder %s716_s14, 2 }
  0x11   : > { %s794_s23 = scalar_select %p53_p7, %s704_s11, %s55_s18  }
  0x12   : > { %p796_p11 = por %p134_p10, %p68_p3  ;;  %p509_p13 = scmp.lt.s32.totalorder %s716_s14, 2 }
  0x13   : > { %s154_s25 = sand.u32 1, %s704_s11   ;;  %s490_s27 = sshll.u32 %s712_s13, 2 }
  0x14   : > { %s468_s26 = sshll.u32 %s154_s25, 2  ;;  %s167_s30 = scalar_lea.hbm %s899_s0, %s490_s27 }
  0x15   : > { %s158_s3 = scalar_lea.vmem [#allocation2], %s468_s26  ;;  %s168_s5 = sshll.u32 %s167_s30, 4  ;;  %s169_s5 = int_to_ptr.hbm [resolvable:$true] %s168_s5 }
  0x16   : > { %s170_s4 = sshll.u32 %s158_s3, 4  ;;  %p809_p0 = pnand %p509_p13, %p779_p4  ;;  %s171_s4 = int_to_ptr.vmem [resolvable:$true] %s170_s4 }
  0x17   : > { %p473_p1 = scmp.ge.s32.totalorder %s716_s14, 1  ;;  %s155_s7 = scalar_lea.sflag [#allocation3], %s154_s25 }
  0x18   : > { %s718_s8 = smov 32   ;;  %s719_s15 = smov 2  }
  0x19   : > { %501 = dma.hbm_to_vmem [thread:$0]  (!%p809_p0), %s169_s5, 64, %s171_s4, %s155_s7, %s718_s8, %s718_s8, %s719_s15  }
  0x1a   : > { %p201_p2 = scmp.lt.s32.totalorder %s716_s14, 3  ;;  %s471_s16 = sshll.u32 %s154_s25, 1 }
  0x1b   : > { %s472_s18 = sshll.u32 %s712_s13, 1  ;;  %s184_s27 = scalar_lea.vmem [#allocation5], %s471_s16 }
  0x1c   : > { %p202_p3 = pnand %p473_p1, %p201_p2  ;;  %s192_s19 = scalar_lea.hbm %s900_s1, %s472_s18 }
  0x1d   : > { %s196_s28 = sshll.u32 %s184_s27, 4  ;;  %s194_s29 = sshll.u32 %s192_s19, 4  ;;  %s197_s28 = int_to_ptr.vmem [resolvable:$true] %s196_s28  ;;  %s195_s29 = int_to_ptr.hbm [resolvable:$true] %s194_s29 }
  0x1e   : > { %s181_s30 = scalar_lea.sflag [#allocation6], %s154_s25  ;;  %205 = sbr.rel (%p202_p3) target bundleno = 106 (0x6a), region = 28 }
  0x1f   : > { %504 = dma.hbm_to_vmem [thread:$0]  (!%p809_p0), %s195_s29, 32, %s197_s28, %s181_s30  }
  0x20   : > { %s824_s3 = sand.u32 (!%p202_p3), 1, %s700_s10  }
  0x21   : > { %s474_s4 = sshll.u32 (!%p202_p3), %s824_s3, 2  ;;  %s208_s5 = scalar_lea.sflag (!%p202_p3), [#allocation3], %s824_s3 }
  0x22   : > { %s211_s7 = scalar_lea.vmem (!%p202_p3), [#allocation2], %s474_s4 }
  0x23   : > { %683 = dma.done.wait (%p785_p8), %s208_s5, 64  }
  0x24   : > { %685 = vsyncadd (%p785_p8), %s208_s5, 4294967232  ;;  %s475_s25 = sshll.u32 %s824_s3, 1  ;;  %s218_s6 = scalar_lea.sflag [#allocation6], %s824_s3 }
  0x25   : > { %s221_s8 = scalar_lea.vmem [#allocation5], %s475_s25 }
  0x26   : > { %687 = dma.done.wait (%p785_p8), %s218_s6, 32  }
  0x27   : > { %689 = vsyncadd (%p785_p8), %s218_s6, 4294967264  ;;  %s476_s15 = sshll.u32 %s824_s3, 5  ;;  %v720_v0 = vmov 0.0   ;;  %v262_v1 = vld [vmem:[%s211_s7] sm:$0x3]  ;;  %vm289_vm1 = vcmask 1041408  }
  0x28   : > { %s839_s16 = scalar_lea.vmem [#allocation7], %s476_s15  ;;  %v477_v2 = vld [vmem:[%s211_s7 + $0x2] sm:$0x3]  ;;  %v265_v7 = vld [vmem:[%s221_s8] sm:$0x3]  ;;  %s491_s21 = sshll.u32 %s708_s12, 5 }
  0x29   : > { %258 = vst [vmem:[%s839_s16] sm:$0xff] %v720_v0  ;;  %v267_v3 = vsub.f32 %v477_v2, %v262_v1  ;;  %vm266_vm0 = vcmp.ne.s32.totalorder %v265_v7, 0  ;;  %s347_s26 = scalar_lea.hbm %s901_s2, %s491_s21  ;;  %s348_s12 = sshll.u32 %s839_s16, 4  ;;  %s349_s12 = int_to_ptr.vmem [resolvable:$true] %s348_s12 }
  0x2a   : > { %259 = vst [vmem:[%s839_s16 + $0x8] sm:$0xff] %v720_v0  ;;  %v478_v8 = vsel %vm266_vm0, 1.0, %v720_v0  ;;  %s350_s19 = sshll.u32 %s347_s26, 4  ;;  %s334_s27 = scalar_lea.sflag [#allocation4], %s824_s3  ;;  %s351_s19 = int_to_ptr.hbm [resolvable:$true] %s350_s19 }
  0x2b   : > { %260 = vst [vmem:[%s839_s16 + $0x10] sm:$0xff] %v720_v0  ;;  %v268_v4 = vand.u32 2147483647, %v267_v3  ;;  %v304_v9 = vsel %vm289_vm1, %v478_v8, 0.0  ;;  %v275_v16 = vmin.f32 %v267_v3, 0.0  ;;  %s644_s28 = sshra.s32 %s351_s19, 4  ;;  %s645_s28 = int_to_ptr.hbm [resolvable:$true] %s644_s28 }
  0x2c   : > { %261 = vst [vmem:[%s839_s16 + $0x18] sm:$0xff] %v720_v0  ;;  %v305_v10 = vrot.slane %v304_v9, 4  ;;  %s646_s29 = scalar_lea.hbm %s645_s28, 32  ;;  %s650_s5 = scalar_lea.hbm %s901_s2, 64 }
  0x2d   : > { %v269_v5 = vsub.f32 0.0, %v268_v4  ;;  %p647_p4 = scmp.ne.s32.totalorder %s645_s28, %s646_s29  ;;  %p651_p7 = scmp.lt.s32.totalorder %s645_s28, %s901_s2 }
  0x2e   : > { %v306_v13 = vadd.f32 %v305_v10, %v304_v9  ;;  %p652_p8 = scmp.lt.s32.totalorder %s650_s5, %s646_s29 }
  0x2f   : > { %v270_v6 = vmul.f32 1.442695, %v269_v5  ;;  %p648_p5 = pnand %p647_p4, %p789_p9 }
  0x30   : > { %v307_v14 = vrot.slane %v306_v13, 2  ;;  %v318_v55 = vld [vmem:[%s839_s16] sm:$0x1]  ;;  %p653_p10 = por %p652_p8, %p651_p7 }
  0x31   : > { %564 = vpow2.f32 %v270_v6  ;;  %v479_v50 = vld [vmem:[%s839_s16 + $0x8] sm:$0x1]  ;;  %p649_p6 = pneg %p648_p5 }
  0x32   : > { %v308_v15 = vadd.f32 %v307_v14, %v306_v13  ;;  %v481_v22 = vld [vmem:[%s839_s16 + $0x10] sm:$0x1] }
  0x33   : > { %v483_v54 = vld [vmem:[%s839_s16 + $0x18] sm:$0x1]  ;;  %p654_p13 = pnand %p653_p10, %p649_p6 }
  0x34   : > { %v309_v18 = vrot.slane %v308_v15, 1 }
  0x36   : > { %v310_v20 = vadd.f32 %v309_v18, %v308_v15 }
  0x37   : > { %v565_v11 = vpop.eup %564 }
  0x38   : > { %v272_v12 = vadd.f32 1.0, %v565_v11  ;;  %v327_v23 = vadd.f32 %v481_v22, %v310_v20 }
  0x3a   : > { %566 = vlog2.f32 %v272_v12  ;;  %482 = vst [vmem:[%s839_s16 + $0x10] sm:$0x1] %v327_v23 }
  0x40   : > { %v567_v17 = vpop.eup %566 }
  0x41   : > { %v274_v19 = vmul.f32 0.6931472, %v567_v17 }
  0x43   : > { %v276_v21 = vsub.f32 %v275_v16, %v274_v19 }
  0x45   : > { %v277_v24 = vsub.f32 %v276_v21, %v267_v3 }
  0x47   : > { %v278_v25 = vsel %vm266_vm0, %v276_v21, %v277_v24 }
  0x48   : > { %v279_v26 = vmul.f32 1.442695, %v278_v25  ;;  %v284_v29 = vsub.f32 0.0, %v278_v25 }
  0x4a   : > { %568 = vpow2.f32 %v279_v26 }
  0x50   : > { %v569_v27 = vpop.eup %568 }
  0x51   : > { %v281_v28 = vsub.f32 1.0, %v569_v27 }
  0x53   : > { %v282_v30 = vsel %vm266_vm0, %v569_v27, %v281_v28  ;;  %v283_v31 = vmul.f32 %v281_v28, %v281_v28 }
  0x54   : > { %v288_v32 = vmul.f32 %v478_v8, %v282_v30  ;;  %v297_v33 = vsel %vm289_vm1, %v282_v30, 0.0 }
  0x55   : > { %v285_v34 = vmul.f32 %v284_v29, %v283_v31  ;;  %v298_v35 = vrot.slane %v297_v33, 4 }
  0x56   : > { %v311_v36 = vsel %vm289_vm1, %v288_v32, 0.0 }
  0x57   : > { %v290_v37 = vsel %vm289_vm1, %v285_v34, 0.0  ;;  %v299_v38 = vadd.f32 %v298_v35, %v297_v33  ;;  %v312_v39 = vrot.slane %v311_v36, 4 }
  0x58   : > { %v291_v40 = vrot.slane %v290_v37, 4 }
  0x59   : > { %v300_v41 = vrot.slane %v299_v38, 2  ;;  %v313_v42 = vadd.f32 %v312_v39, %v311_v36 }
  0x5a   : > { %v292_v43 = vadd.f32 %v291_v40, %v290_v37 }
  0x5b   : > { %v301_v44 = vadd.f32 %v300_v41, %v299_v38  ;;  %v314_v45 = vrot.slane %v313_v42, 2 }
  0x5c   : > { %v293_v46 = vrot.slane %v292_v43, 2 }
  0x5d   : > { %v302_v47 = vrot.slane %v301_v44, 1  ;;  %v315_v48 = vadd.f32 %v314_v45, %v313_v42 }
  0x5e   : > { %v294_v49 = vadd.f32 %v293_v46, %v292_v43 }
  0x5f   : > { %v303_v51 = vadd.f32 %v302_v47, %v301_v44  ;;  %v316_v52 = vrot.slane %v315_v48, 1 }
  0x60   : > { %v295_v53 = vrot.slane %v294_v49, 1 }
  0x61   : > { %v323_v56 = vadd.f32 %v479_v50, %v303_v51  ;;  %v317_v57 = vadd.f32 %v316_v52, %v315_v48 }
  0x62   : > { %v296_v58 = vadd.f32 %v295_v53, %v294_v49 }
  0x63   : > { %480 = vst [vmem:[%s839_s16 + $0x8] sm:$0x1] %v323_v56  ;;  %v331_v59 = vadd.f32 %v483_v54, %v317_v57 }
  0x64   : > { %v319_v60 = vadd.f32 %v318_v55, %v296_v58 }
  0x65   : > { %484 = vst [vmem:[%s839_s16 + $0x18] sm:$0x1] %v331_v59 }
  0x66   : > { %320 = vst [vmem:[%s839_s16] sm:$0x1] %v319_v60 }
  0x67   : > { %657 = shalt.err (!%p654_p13)
}
  0x68   : > { %s721_s3 = smov 128   ;;  %s722_s6 = smov 8  }
  0x69   : > { %496 = dma.vmem_to_hbm [thread:$0]  (%p789_p9), %s349_s12, 512, %s351_s19, %s334_s27, %s721_s3, %s721_s3, %s722_s6  }
  0x6a PF: > { %s365_s8 = sand.u32 1, %s696_s9   ;;  %p506_p0 = pnand %p467_p12, %p796_p11 }
  0x6b   : > { %s366_s15 = scalar_lea.sflag [#allocation4], %s365_s8 }
  0x6c   : > { %p507_p1 = pneg %p506_p0 }
  0x6e   : > { %691 = dma.done.wait (%p507_p1), %s366_s15, 512  }
  0x6f   : > { %693 = vsyncadd (%p507_p1), %s366_s15, 4294966784  ;;  %s21_s14 = sadd.s32 1, %s716_s14   ;;  %s907_s9 = smov %s700_s10 }
  0x70   : > { %p18_p2 = scmp.ge.s32.totalorder %s21_s14, 4   ;;  %s908_s10 = smov %s704_s11 }
  0x71   : > { %s909_s11 = smov %s794_s23  ;;  %s910_s12 = smov %s712_s13 }
  0x72   : > { %s911_s13 = smov %s913_s17  ;;  %20 = sbr.rel (!%p18_p2) target bundleno = 8 (0x8), region = 94 }
  0x77   :  { %372 = vsyncpa [#allocation3], 1 }
  0x78   :  { %374 = vsyncpa [#allocation3 + $0x1], 1 }
  0x79   :  { %375 = vsyncpa [#allocation6], 1 }
  0x7a   :  { %377 = vsyncpa [#allocation6 + $0x1], 1 }
  0x7b   :  { %378 = vsyncpa [#allocation4], 1 }
  0x7c   :  { %380 = vsyncpa [#allocation4 + $0x1], 1 }

</bundles_post_ra>
